<compile_context>
chip_gen: v7x
topology: tpu7x:2x2x1
jax: 0.10.0
libtpu: 0.0.40
codegen_flags: <defaults>
</compile_context>

<pallas_src>
import functools

import numpy as np
import jax
import jax.numpy as jnp
from jax import lax
from jax.experimental import pallas as pl
from jax.experimental.pallas import tpu as pltpu


def _softmax_body_kernel(x_ref, g_ref, act_ref, m_sc, idx_sc, *, T, num_actions):
    """One A-tile of: log_softmax(x*T, dim=0) + gumbel -> running row argmax."""
    ai = pl.program_id(0)
    blk_b, blk_a = x_ref.shape

    @pl.when(ai == 0)
    def _init():
        m_sc[...] = jnp.full(m_sc.shape, -jnp.inf, dtype=m_sc.dtype)
        idx_sc[...] = jnp.zeros(idx_sc.shape, dtype=idx_sc.dtype)

    # log-softmax over dim 0 (rows).  Every column of this A-tile is complete,
    # so the column-wise normalisation is tile-local (no cross-tile reduction).
    x = x_ref[...].astype(jnp.float32) * T
    col_max = jnp.max(x, axis=0, keepdims=True)                       # (1, blk_a)
    col_lse = jnp.log(jnp.sum(jnp.exp(x - col_max), axis=0, keepdims=True))
    logp = (x - col_max) - col_lse                                    # (blk_b, blk_a)

    # Gumbel-max categorical draw along the action (lane) axis; padded columns
    # (global index >= num_actions) are masked to -inf so they are never drawn.
    col_ids = lax.broadcasted_iota(jnp.int32, (blk_b, blk_a), 1) + ai * blk_a
    z = jnp.where(col_ids < num_actions, logp + g_ref[...], -jnp.inf)

    tile_max = jnp.max(z, axis=1, keepdims=True)                      # (blk_b, 1)
    tile_arg = jnp.min(
        jnp.where(z == tile_max, col_ids, jnp.int32(2**31 - 1)),
        axis=1, keepdims=True)                                        # (blk_b, 1) int32

    better = tile_max > m_sc[...]          # strict ">" keeps the lowest tied index
    m_sc[...] = jnp.where(better, tile_max, m_sc[...])
    idx_sc[...] = jnp.where(better, tile_arg, idx_sc[...])

    @pl.when(ai == pl.num_programs(0) - 1)
    def _finalize():
        # Lane-dense (unmasked) int32 writeback; the wrapper slices [:, :1].
        act_ref[...] = jnp.broadcast_to(idx_sc[...], act_ref.shape)


def _round_up(x, m):
    return ((x + m - 1) // m) * m


@functools.partial(jax.jit, static_argnames=("T",))
def softmax_body(outputs, key, *, T=1.0):
    """Mirror of SoftmaxBody.forward.

    outputs: (B, A) float32 logits; key: jax PRNG key (plays the role of
    torch's global RNG state).  Returns actions of shape (B, 1), int32.
    """
    B, A = outputs.shape

    # One standard Gumbel per (row, action), drawn at the logical (B, A) shape
    # so the sample is independent of the padding / tiling chosen below.
    gumbel = jax.random.gumbel(key, (B, A), jnp.float32)

    # Action-axis tiling: lane blocks that are a multiple of 128, capped at 512.
    blk_a = min(512, _round_up(A, 128))
    a_pad = _round_up(A, blk_a)
    if a_pad != A:
        pad = ((0, 0), (0, a_pad - A))
        x_p = jnp.pad(outputs, pad)       # padded columns masked in-kernel
        g_p = jnp.pad(gumbel, pad)
    else:
        x_p, g_p = outputs, gumbel

    kernel = functools.partial(_softmax_body_kernel, T=float(T), num_actions=A)
    actions_wide = pl.pallas_call(
        kernel,
        out_shape=jax.ShapeDtypeStruct((B, 128), jnp.int32),
        grid_spec=pltpu.PrefetchScalarGridSpec(
            num_scalar_prefetch=0,
            grid=(a_pad // blk_a,),
            in_specs=[pl.BlockSpec((B, blk_a), lambda a: (0, a)),   # logits
                      pl.BlockSpec((B, blk_a), lambda a: (0, a))],  # gumbel noise
            out_specs=pl.BlockSpec((B, 128), lambda a: (0, 0)),
            scratch_shapes=[pltpu.VMEM((B, 1), jnp.float32),        # running max
                            pltpu.VMEM((B, 1), jnp.int32)],         # running argmax
        ),
        compiler_params=pltpu.CompilerParams(
            dimension_semantics=("arbitrary",),        # running argmax across A-blocks
            vmem_limit_bytes=32 * 1024 * 1024,         # fits v5e/v6e/v7x scoped VMEM
        ),
    )(x_p, g_p)

    return actions_wide[:, :1]                                        # (B, 1) int32


if __name__ == "__main__":
    T = 1.0
    B, A = 2, 6                      # batch of 2 logit rows over 6 actions
    key = jax.random.PRNGKey(0)
    k_x, k_sample = jax.random.split(key)
    outputs = jax.random.normal(k_x, (B, A), jnp.float32)

    actions = softmax_body(outputs, k_sample, T=T)
    jax.block_until_ready(actions)

    assert actions.shape == (B, 1) and actions.dtype == jnp.int32
    assert bool(jnp.all((actions >= 0) & (actions < A)))

    # Deterministic reference: identical Gumbel noise + pure-JAX Gumbel-max over
    # the dim-0 softmax log-probabilities (row renormalisation is a per-row
    # constant, so it cannot change the argmax).
    xT = outputs * T
    col_max = jnp.max(xT, axis=0, keepdims=True)
    logp = (xT - col_max) - jnp.log(
        jnp.sum(jnp.exp(xT - col_max), axis=0, keepdims=True))
    g = jax.random.gumbel(k_sample, (B, A), jnp.float32)
    ref_actions = jnp.argmax(logp + g, axis=1).astype(jnp.int32).reshape(B, 1)
    np.testing.assert_array_equal(np.asarray(actions), np.asarray(ref_actions))

    print("KERNEL_OK")
</pallas_src>

<mosaic_0001>
module attributes {stable_mosaic.version = 11 : i64} {
  func.func @_softmax_body_kernel(%arg0: i32, %arg1: memref<2x128xf32, #tpu.memory_space<vmem>>, %arg2: memref<2x128xf32, #tpu.memory_space<vmem>>, %arg3: memref<2x128xi32, #tpu.memory_space<vmem>>, %arg4: memref<2x1xf32, #tpu.memory_space<vmem>>, %arg5: memref<2x1xi32, #tpu.memory_space<vmem>>) attributes {dimension_semantics = [#tpu.dimension_semantics<arbitrary>], iteration_bounds = array<i64: 1>, scalar_prefetch = 0 : i64, scratch_operands = 2 : i64, tpu.core_type = #tpu.core_type<tc>, window_params = [{transform_indices = @transform_0, window_bounds = array<i64: 2, 128>}, {transform_indices = @transform_1, window_bounds = array<i64: 2, 128>}, {pipeline_mode = #tpu.pipeline_mode<synchronous>, transform_indices = @transform_2, window_bounds = array<i64: 2, 128>}]} {
    %c0_i32 = arith.constant 0 : i32
    %0 = arith.cmpi eq, %arg0, %c0_i32 : i32
    %1 = arith.extui %0 : i1 to i32
    %c0_i32_0 = arith.constant 0 : i32
    %2 = arith.cmpi ne, %1, %c0_i32_0 : i32
    scf.if %2 {
      %cst_21 = arith.constant 0xFF800000 : f32
      %47 = vector.broadcast %cst_21 : f32 to vector<2x1xf32>
      %c0_22 = arith.constant 0 : index
      %c0_23 = arith.constant 0 : index
      %48 = vector.load %arg4[%c0_22, %c0_23] : memref<2x1xf32, #tpu.memory_space<vmem>>, vector<2x1xf32>
      tpu.vector_store %arg4[%c0_22, %c0_23], %47 {strides = array<i32>} : memref<2x1xf32, #tpu.memory_space<vmem>>, vector<2x1xf32>,
      %c0_i32_24 = arith.constant 0 : i32
      %49 = vector.broadcast %c0_i32_24 : i32 to vector<2x1xi32>
      %c0_25 = arith.constant 0 : index
      %c0_26 = arith.constant 0 : index
      %50 = vector.load %arg5[%c0_25, %c0_26] : memref<2x1xi32, #tpu.memory_space<vmem>>, vector<2x1xi32>
      tpu.vector_store %arg5[%c0_25, %c0_26], %49 {strides = array<i32>} : memref<2x1xi32, #tpu.memory_space<vmem>>, vector<2x1xi32>,
    } else {
    }
    %c0 = arith.constant 0 : index
    %c0_1 = arith.constant 0 : index
    %3 = vector.load %arg1[%c0, %c0_1] : memref<2x128xf32, #tpu.memory_space<vmem>>, vector<2x128xf32>
    %cst = arith.constant 1.000000e+00 : f32
    %4 = vector.broadcast %cst : f32 to vector<2x128xf32>
    %5 = arith.mulf %3, %4 : vector<2x128xf32>
    %cst_2 = arith.constant dense<0xFF800000> : vector<128xf32>
    %6 = vector.multi_reduction <maximumf>, %5, %cst_2 [0] : vector<2x128xf32> to vector<128xf32>
    %7 = vector.shape_cast %6 : vector<128xf32> to vector<1x128xf32>
    %8 = vector.broadcast %7 : vector<1x128xf32> to vector<2x128xf32>
    %9 = arith.subf %5, %8 : vector<2x128xf32>
    %10 = math.exp %9 : vector<2x128xf32>
    %cst_3 = arith.constant dense<0.000000e+00> : vector<128xf32>
    %11 = vector.multi_reduction <add>, %10, %cst_3 [0] : vector<2x128xf32> to vector<128xf32>
    %12 = vector.shape_cast %11 : vector<128xf32> to vector<1x128xf32>
    %13 = math.log %12 : vector<1x128xf32>
    %14 = vector.broadcast %7 : vector<1x128xf32> to vector<2x128xf32>
    %15 = arith.subf %5, %14 : vector<2x128xf32>
    %16 = vector.broadcast %13 : vector<1x128xf32> to vector<2x128xf32>
    %17 = arith.subf %15, %16 : vector<2x128xf32>
    %18 = tpu.iota {dimensions = array<i32: 1>} : vector<2x128xi32>
    %c128_i32 = arith.constant 128 : i32
    %19 = arith.muli %arg0, %c128_i32 : i32
    %20 = vector.broadcast %19 : i32 to vector<2x128xi32>
    %21 = arith.addi %18, %20 : vector<2x128xi32>
    %c6_i32 = arith.constant 6 : i32
    %22 = vector.broadcast %c6_i32 : i32 to vector<2x128xi32>
    %23 = arith.cmpi slt, %21, %22 : vector<2x128xi32>
    %c0_4 = arith.constant 0 : index
    %c0_5 = arith.constant 0 : index
    %24 = vector.load %arg2[%c0_4, %c0_5] : memref<2x128xf32, #tpu.memory_space<vmem>>, vector<2x128xf32>
    %25 = arith.addf %17, %24 : vector<2x128xf32>
    %cst_6 = arith.constant 0xFF800000 : f32
    %26 = vector.broadcast %cst_6 : f32 to vector<2x128xf32>
    %27 = arith.select %23, %25, %26 : vector<2x128xi1>, vector<2x128xf32>
    %cst_7 = arith.constant dense<0xFF800000> : vector<2xf32>
    %28 = vector.multi_reduction <maximumf>, %27, %cst_7 [1] : vector<2x128xf32> to vector<2xf32>
    %29 = vector.shape_cast %28 : vector<2xf32> to vector<2x1xf32>
    %30 = vector.broadcast %29 : vector<2x1xf32> to vector<2x128xf32>
    %31 = arith.cmpf oeq, %27, %30 : vector<2x128xf32>
    %c2147483647_i32 = arith.constant 2147483647 : i32
    %32 = vector.broadcast %c2147483647_i32 : i32 to vector<2x128xi32>
    %33 = arith.select %31, %21, %32 : vector<2x128xi1>, vector<2x128xi32>
    %cst_8 = arith.constant dense<2147483647> : vector<2xi32>
    %34 = vector.multi_reduction <minsi>, %33, %cst_8 [1] : vector<2x128xi32> to vector<2xi32>
    %35 = vector.shape_cast %34 : vector<2xi32> to vector<2x1xi32>
    %c0_9 = arith.constant 0 : index
    %c0_10 = arith.constant 0 : index
    %36 = vector.load %arg4[%c0_9, %c0_10] : memref<2x1xf32, #tpu.memory_space<vmem>>, vector<2x1xf32>
    %37 = arith.cmpf ogt, %29, %36 : vector<2x1xf32>
    %c0_11 = arith.constant 0 : index
    %c0_12 = arith.constant 0 : index
    %38 = vector.load %arg4[%c0_11, %c0_12] : memref<2x1xf32, #tpu.memory_space<vmem>>, vector<2x1xf32>
    %39 = arith.select %37, %29, %38 : vector<2x1xi1>, vector<2x1xf32>
    %c0_13 = arith.constant 0 : index
    %c0_14 = arith.constant 0 : index
    %40 = vector.load %arg4[%c0_13, %c0_14] : memref<2x1xf32, #tpu.memory_space<vmem>>, vector<2x1xf32>
    tpu.vector_store %arg4[%c0_13, %c0_14], %39 {strides = array<i32>} : memref<2x1xf32, #tpu.memory_space<vmem>>, vector<2x1xf32>,
    %c0_15 = arith.constant 0 : index
    %c0_16 = arith.constant 0 : index
    %41 = vector.load %arg5[%c0_15, %c0_16] : memref<2x1xi32, #tpu.memory_space<vmem>>, vector<2x1xi32>
    %42 = arith.select %37, %35, %41 : vector<2x1xi1>, vector<2x1xi32>
    %c0_17 = arith.constant 0 : index
    %c0_18 = arith.constant 0 : index
    %43 = vector.load %arg5[%c0_17, %c0_18] : memref<2x1xi32, #tpu.memory_space<vmem>>, vector<2x1xi32>
    tpu.vector_store %arg5[%c0_17, %c0_18], %42 {strides = array<i32>} : memref<2x1xi32, #tpu.memory_space<vmem>>, vector<2x1xi32>,
    %c0_i32_19 = arith.constant 0 : i32
    %44 = arith.cmpi eq, %arg0, %c0_i32_19 : i32
    %45 = arith.extui %44 : i1 to i32
    %c0_i32_20 = arith.constant 0 : i32
    %46 = arith.cmpi ne, %45, %c0_i32_20 : i32
    scf.if %46 {
      %c0_21 = arith.constant 0 : index
      %c0_22 = arith.constant 0 : index
      %47 = vector.load %arg5[%c0_21, %c0_22] : memref<2x1xi32, #tpu.memory_space<vmem>>, vector<2x1xi32>
      %48 = vector.shape_cast %47 : vector<2x1xi32> to vector<2x1xi32>
      %49 = vector.broadcast %48 : vector<2x1xi32> to vector<2x128xi32>
      %c0_23 = arith.constant 0 : index
      %c0_24 = arith.constant 0 : index
      %50 = vector.load %arg3[%c0_23, %c0_24] : memref<2x128xi32, #tpu.memory_space<vmem>>, vector<2x128xi32>
      tpu.vector_store %arg3[%c0_23, %c0_24], %49 {strides = array<i32>} : memref<2x128xi32, #tpu.memory_space<vmem>>, vector<2x128xi32>,
    } else {
    }
    return
  }
  func.func @transform_0(%arg0: i32) -> (i32, i32) {
    %c0_i32 = arith.constant 0 : i32
    %c0_i32_0 = arith.constant 0 : i32
    return %c0_i32, %arg0 : i32, i32
  }
  func.func @transform_1(%arg0: i32) -> (i32, i32) {
    %c0_i32 = arith.constant 0 : i32
    %c0_i32_0 = arith.constant 0 : i32
    return %c0_i32, %arg0 : i32, i32
  }
  func.func @transform_2(%arg0: i32) -> (i32, i32) {
    %c0_i32 = arith.constant 0 : i32
    %c0_i32_0 = arith.constant 0 : i32
    %c0_i32_1 = arith.constant 0 : i32
    return %c0_i32, %c0_i32_0 : i32, i32
  }
}

</mosaic_0001>

<bundles_post_ra>
// kernel: softmax_body.1
= control target key start
LH: loop header
LB: loop body
LE: loop exit
PB: predicated region body
PF: predicated region fallthrough
CT: control target
= control target key end

     0   :  { %vm19_vm0 = vcmask 1041408   ;;  %vm15_vm1 = vcmask 1024   ;;  %v97_v1 = vmov -inf   ;;  %v40_v19 = vlaneseq  ;;  %s133_s0 = inlined_call_operand.vmem [shape: f32[2,128], index: 0, kind: input, shape index: {}]   ;;  %s134_s1 = inlined_call_operand.vmem [shape: f32[2,128], index: 1, kind: input, shape index: {}]   ;;  %s135_s2 = inlined_call_operand.vmem [shape: s32[2,128], index: 2, kind: output, shape index: {}]  }
   0x1   :  { %v18_v0 = vld [vmem:[%s133_s0] sm:$0x3]  ;;  %16 = vst.msk [vmem:[#allocation2] sm:$0x3] %vm15_vm1, %v97_v1  ;;  %v98_v39 = vmov 0  }
   0x2   :  { %v20_v2 = vsel %vm19_vm0, %v18_v0, -inf  ;;  %v41_v21 = vand.u32 127, %v40_v19  ;;  %v46_v23 = vld [vmem:[%s134_s1] sm:$0x3]  ;;  %91 = vset.pattern.permute.xlu1 %v98_v39  ;;  %17 = vst.msk [vmem:[#allocation3] sm:$0x3] %vm15_vm1, %v98_v39  ;;  %92 = vset.pattern.permute.xlu0 %v98_v39 }
   0x3   :  { %v21_v3 = vrot.slane %v20_v2, 4 }
   0x4   :  { %vm45_vm2 = vcmp.lt.s32.totalorder %v41_v21, 6 }
   0x5   :  { %v22_v4 = vmax.f32 %v20_v2, %v21_v3 }
   0x7   :  { %v23_v5 = vrot.slane %v22_v4, 2 }
   0x8   :  { %v69_v28 = vld [vmem:[#allocation2] sm:$0x3] }
   0x9   :  { %v24_v6 = vmax.f32 %v22_v4, %v23_v5  ;;  %v74_v44 = vld [vmem:[#allocation3] sm:$0x3] }
   0xb   :  { %v25_v7 = vrot.slane %v24_v6, 1 }
   0xd   :  { %v26_v8 = vmax.f32 %v24_v6, %v25_v7 }
   0xf   :  { %v27_v9 = vsub.f32 %v18_v0, %v26_v8 }
  0x11   :  { %v28_v10 = vmul.f32 1.442695, %v27_v9 }
  0x13   :  { %93 = vpow2.f32 %v28_v10 }
  0x1d   :  { %v94_v11 = vpop.eup %93 }
  0x1e   :  { %v30_v12 = vsel %vm19_vm0, %v94_v11, 0.0 }
  0x1f   :  { %v31_v13 = vrot.slane %v30_v12, 4 }
  0x21   :  { %v32_v14 = vadd.f32 %v31_v13, %v30_v12 }
  0x23   :  { %v33_v15 = vrot.slane %v32_v14, 2 }
  0x25   :  { %v34_v16 = vadd.f32 %v33_v15, %v32_v14 }
  0x27   :  { %v35_v17 = vrot.slane %v34_v16, 1 }
  0x29   :  { %v36_v18 = vadd.f32 %v35_v17, %v34_v16 }
  0x2b   :  { %95 = vlog2.f32 %v36_v18 }
  0x35   :  { %v96_v20 = vpop.eup %95 }
  0x36   :  { %v38_v22 = vmul.f32 0.6931472, %v96_v20 }
  0x38   :  { %v39_v24 = vsub.f32 %v27_v9, %v38_v22 }
  0x3a   :  { %v47_v25 = vadd.f32 %v46_v23, %v39_v24 }
  0x3c   :  { %v48_v26 = vsel %vm45_vm2, %v47_v25, -inf }
  0x3d   :  { %v49_v27 = vsel %vm19_vm0, %v48_v26, -inf }
  0x3e   :  { %50 = vmax.xlane.f32.xlu0 %v49_v27 }
  0xcb   :  { %v51_v29 = vpop.xlane.xlu0 %50 }
  0xcc   :  { %vm52_vm3 = vcmp.eq.f32.partialorder %v48_v26, %v51_v29  ;;  %vm70_vm4 = vcmp.gt.f32.partialorder %v51_v29, %v69_v28 }
  0xcd   :  { %v71_v30 = vsel %vm70_vm4, %v51_v29, %v69_v28  ;;  %v53_v31 = vsel %vm52_vm3, %v41_v21, 2147483647 }
  0xce   :  { %73 = vst.msk [vmem:[#allocation2] sm:$0x3] %vm15_vm1, %v71_v30  ;;  %v54_v32 = vsel %vm19_vm0, %v53_v31, 2147483647 }
  0xcf   :  { %v56_v33 = vshra.s32 %v54_v32, 16  ;;  %v55_v35 = vand.u32 65535, %v54_v32 }
  0xd1   :  { %v58_v34 = vcvt.s32.f32 %v56_v33  ;;  %v57_v37 = vcvt.s32.f32 %v55_v35 }
  0xd3   :  { %59 = vmin.xlane.f32.xlu0 %v58_v34 }
 0x160   :  { %v60_v36 = vpop.xlane.xlu0 %59 }
 0x161   :  { %vm61_vm5 = vcmp.eq.f32.partialorder %v58_v34, %v60_v36  ;;  %v66_v40 = vcvt.f32.s32 %v60_v36 }
 0x162   :  { %v62_v38 = vsel %vm61_vm5, %v57_v37, inf }
 0x163   :  { %63 = vmin.xlane.f32.xlu1 %v62_v38  ;;  %v67_v42 = vshll.u32 %v66_v40, 16 }
 0x1f0   :  { %v64_v41 = vpop.xlane.xlu1 %63 }
 0x1f1   :  { %v65_v43 = vcvt.f32.s32 %v64_v41 }
 0x1f3   :  { %v68_v45 = vadd.s32 %v67_v42, %v65_v43 }
 0x1f5   :  { %v75_v46 = vsel %vm70_vm4, %v68_v45, %v74_v44 }
 0x1f6   :  { %76 = vst.msk [vmem:[#allocation3] sm:$0x3] %vm15_vm1, %v75_v46 }
 0x1fd   :  { %v80_v47 = vld [vmem:[#allocation3] sm:$0x3] }
 0x1fe   :  { %82 = vperm.xlu1 %91, %v80_v47  }
 0x27d   :  { %v83_v48 = vpop.permute.xlu1 %82 }
 0x27e   :  { %84 = vst [vmem:[%s135_s2] sm:$0x3] %v83_v48 }

</bundles_post_ra>
